<compile_context>
chip_gen: v7x
topology: tpu7x:2x2x1
jax: 0.10.0
libtpu: 0.0.40
codegen_flags: <defaults>
</compile_context>

<pallas_src>
import functools
import math

import jax
import jax.numpy as jnp
from jax import lax
from jax.experimental import pallas as pl
from jax.experimental.pallas import tpu as pltpu

LN_EPS = 1e-5
_INV_SQRT2 = 1.0 / math.sqrt(2.0)


def _round_up(x, m):
    return ((x + m - 1) // m) * m


# --------------------------- hardware introspection helpers ---------------------------

def _device_kind():
    try:
        return jax.devices()[0].device_kind.lower()
    except Exception:
        return ""


@functools.lru_cache(maxsize=None)
def _lane_granule():
    # v6e/v7x MXUs are 2x256x256 -> pad feature dims to 256; v5e (4x128x128) keeps 128.
    kind = _device_kind()
    if ("v6" in kind) or ("v7" in kind) or ("7x" in kind):
        return 256
    return 128


@functools.lru_cache(maxsize=None)
def _physical_vmem_bytes():
    try:
        info = pltpu.get_tpu_info()
        vb = int(getattr(info, "vmem_capacity_bytes", 0) or 0)
        if vb > 0:
            return vb
    except Exception:
        pass
    kind = _device_kind()
    if ("v7" in kind) or ("7x" in kind):
        return 64 << 20      # v7x: 64 MiB per TensorCore
    return 128 << 20         # v4/v5e/v6e: 128 MiB


@functools.lru_cache(maxsize=None)
def _single_buffer_supported():
    """Probe whether BlockSpec(pipeline_mode=pl.Buffered(1)) compiles, runs and is
    numerically correct on this install (used to single-buffer grid-invariant weights)."""
    try:
        def k(a_ref, b_ref, o_ref):
            o_ref[...] = a_ref[...] + b_ref[...]

        f = pl.pallas_call(
            k,
            out_shape=jax.ShapeDtypeStruct((16, 128), jnp.float32),
            grid=(2,),
            in_specs=[
                pl.BlockSpec((8, 128), lambda i: (0, 0), pipeline_mode=pl.Buffered(1)),
                pl.BlockSpec((8, 128), lambda i: (i, 0)),
            ],
            out_specs=pl.BlockSpec((8, 128), lambda i: (i, 0)),
        )
        a = jnp.full((8, 128), 2.0, jnp.float32)
        b = jnp.arange(16 * 128, dtype=jnp.float32).reshape(16, 128)
        out = jax.block_until_ready(f(a, b))
        want = b + jnp.concatenate([a, a], axis=0)
        return bool(jnp.allclose(out, want))
    except Exception:
        return False


def _invariant_spec(shape, index_map):
    """BlockSpec for a grid-invariant operand: single-buffered when supported."""
    if _single_buffer_supported():
        return pl.BlockSpec(shape, index_map, pipeline_mode=pl.Buffered(1))
    return pl.BlockSpec(shape, index_map)


# ------------------------------------- kernels ----------------------------------------

def _ffn_resident_kernel(x_ref, g_ref, beta_ref, w1_ref, b1_ref, w2_ref, b2_ref, o_ref,
                         *, e_true, n_chunks):
    """Resident-weight path.  One row tile per grid step, split into independent sub-chunks
    so the scheduler can overlap LN/GELU (VPU/XLU/EUP) of one chunk with the MXU matmuls of
    the neighbouring chunk."""
    tm = x_ref.shape[0]
    sub = tm // n_chunks
    inv_e = 1.0 / float(e_true)

    g = g_ref[...]
    be = beta_ref[...]
    b1 = b1_ref[...]
    b2 = b2_ref[...]
    w1 = w1_ref[...]
    w2 = w2_ref[...]

    for j in range(n_chunks):
        x = x_ref[j * sub:(j + 1) * sub, :].astype(jnp.float32)
        # LayerNorm from s1/s2: pad lanes are zero-filled by the wrapper so they contribute
        # nothing to the sums; biased variance like nn.LayerNorm.
        s1 = jnp.sum(x, axis=-1, keepdims=True)
        s2 = jnp.sum(x * x, axis=-1, keepdims=True)
        mu = s1 * inv_e
        var = s2 * inv_e - mu * mu
        # gamma/beta pad lanes are zero -> xn pad lanes end up zero (safe for the matmul).
        xn = (x - mu) * lax.rsqrt(var + LN_EPS) * g + be
        # Linear(E -> H): bf16 MXU operands, f32 accumulate.
        h = jnp.dot(xn.astype(jnp.bfloat16), w1, preferred_element_type=jnp.float32) + b1
        # Exact GELU (erf form, nn.GELU() default), f32 elementwise.
        h = 0.5 * h * (1.0 + lax.erf(h * _INV_SQRT2))
        # Dropout: identity (inference).
        # Linear(H -> E): bf16 MXU operands, f32 accumulate.
        y = jnp.dot(h.astype(jnp.bfloat16), w2, preferred_element_type=jnp.float32) + b2
        o_ref[j * sub:(j + 1) * sub, :] = y.astype(o_ref.dtype)


def _ffn_htiled_kernel(x_ref, g_ref, beta_ref, w1_ref, b1_ref, w2_ref, b2_ref, o_ref,
                       xn_ref, acc_ref, *, e_true):
    """H-tiled path for large E*H: W1/W2 are streamed over the inner (arbitrary) grid axis;
    the normalized input is cached in bf16 scratch and the output accumulated in f32."""
    h_idx = pl.program_id(1)

    @pl.when(h_idx == 0)
    def _():
        x = x_ref[...].astype(jnp.float32)
        inv_e = 1.0 / float(e_true)
        s1 = jnp.sum(x, axis=-1, keepdims=True)
        s2 = jnp.sum(x * x, axis=-1, keepdims=True)
        mu = s1 * inv_e
        var = s2 * inv_e - mu * mu
        xn = (x - mu) * lax.rsqrt(var + LN_EPS) * g_ref[...] + beta_ref[...]
        xn_ref[...] = xn.astype(jnp.bfloat16)
        acc_ref[...] = jnp.zeros_like(acc_ref)

    h = jnp.dot(xn_ref[...], w1_ref[...], preferred_element_type=jnp.float32) + b1_ref[...]
    h = 0.5 * h * (1.0 + lax.erf(h * _INV_SQRT2))
    # Dropout: identity (inference).
    acc_ref[...] += jnp.dot(h.astype(jnp.bfloat16), w2_ref[...],
                            preferred_element_type=jnp.float32)

    @pl.when(h_idx == pl.num_programs(1) - 1)
    def _():
        o_ref[...] = (acc_ref[...] + b2_ref[...]).astype(o_ref.dtype)


# ------------------------------------- wrappers ----------------------------------------

def prepare_ffn_params(gamma, beta, w1, b1, w2, b2, *, lane_granule=None):
    """Pad feature dims to the MXU granule and cast weights to bf16 ONCE; reuse the result
    across calls so the per-call path does no weight re-padding / re-casting."""
    if lane_granule is None:
        lane_granule = _lane_granule()
    E, H = w1.shape
    E_pad = _round_up(E, lane_granule)
    H_pad = _round_up(H, lane_granule)

    g2 = jnp.zeros((1, E_pad), jnp.float32).at[0, :E].set(gamma.astype(jnp.float32))
    be2 = jnp.zeros((1, E_pad), jnp.float32).at[0, :E].set(beta.astype(jnp.float32))
    w1p = jnp.zeros((E_pad, H_pad), jnp.bfloat16).at[:E, :H].set(w1.astype(jnp.bfloat16))
    b1p = jnp.zeros((1, H_pad), jnp.float32).at[0, :H].set(b1.astype(jnp.float32))
    w2p = jnp.zeros((H_pad, E_pad), jnp.bfloat16).at[:H, :E].set(w2.astype(jnp.bfloat16))
    b2p = jnp.zeros((1, E_pad), jnp.float32).at[0, :E].set(b2.astype(jnp.float32))
    return dict(E=E, H=H, E_pad=E_pad, H_pad=H_pad,
                gamma=g2, beta=be2, w1=w1p, b1=b1p, w2=w2p, b2=b2p)


def ffn_apply(x, params, *, tm=256, mode="auto", h_tile=None, vmem_limit_bytes=None):
    """x: (B, S, E).  params: output of prepare_ffn_params.  Returns (B, S, E)."""
    B, S, E = x.shape
    assert E == params["E"], "embedding dim mismatch with prepared params"
    E_pad, H_pad = params["E_pad"], params["H_pad"]
    rows = B * S
    itemsize = x.dtype.itemsize

    granule = _lane_granule()
    phys = _physical_vmem_bytes()
    limit_cap = int(0.85 * phys)   # honest per-generation VMEM budget (never > physical)

    tm_eff = _round_up(min(tm, _round_up(rows, 8)), 8)
    rows_pad = _round_up(rows, tm_eff)

    # Fast path: no activation copy when already aligned; otherwise zero-pad once.
    x2 = x.reshape(rows, E)
    if rows_pad != rows or E_pad != E:
        x2 = jnp.zeros((rows_pad, E_pad), x.dtype).at[:rows, :E].set(x2)

    wbuf = 1 if _single_buffer_supported() else 2
    io_bytes = 2 * 2 * tm_eff * E_pad * itemsize                 # x + out tiles, double-buffered
    resident_weight_bytes = wbuf * 2 * E_pad * H_pad * 2         # W1 + W2 (bf16)
    resident_est = (resident_weight_bytes + io_bytes
                    + 2 * tm_eff * H_pad * 4 + 3 * tm_eff * E_pad * 4 + (2 << 20))

    if mode == "auto":
        mode = "resident" if resident_est <= limit_cap else "htiled"

    n_chunks = 2 if (tm_eff >= 256 and tm_eff % 16 == 0) else 1

    if mode == "resident":
        if vmem_limit_bytes is None:
            vmem_limit_bytes = min(max(int(resident_est * 1.25), 16 << 20), limit_cap)
        grid = (rows_pad // tm_eff,)
        out2 = pl.pallas_call(
            functools.partial(_ffn_resident_kernel, e_true=E, n_chunks=n_chunks),
            out_shape=jax.ShapeDtypeStruct((rows_pad, E_pad), x.dtype),
            grid_spec=pltpu.PrefetchScalarGridSpec(
                num_scalar_prefetch=0,
                grid=grid,
                in_specs=[
                    pl.BlockSpec((tm_eff, E_pad), lambda i: (i, 0)),     # x rows tile
                    _invariant_spec((1, E_pad), lambda i: (0, 0)),       # gamma
                    _invariant_spec((1, E_pad), lambda i: (0, 0)),       # beta
                    _invariant_spec((E_pad, H_pad), lambda i: (0, 0)),   # W1 (bf16, resident)
                    _invariant_spec((1, H_pad), lambda i: (0, 0)),       # b1
                    _invariant_spec((H_pad, E_pad), lambda i: (0, 0)),   # W2 (bf16, resident)
                    _invariant_spec((1, E_pad), lambda i: (0, 0)),       # b2
                ],
                out_specs=pl.BlockSpec((tm_eff, E_pad), lambda i: (i, 0)),
            ),
            compiler_params=pltpu.CompilerParams(
                dimension_semantics=("parallel",),
                vmem_limit_bytes=vmem_limit_bytes,
            ),
        )(x2, params["gamma"], params["beta"], params["w1"], params["b1"],
          params["w2"], params["b2"])
    else:
        # H-tiled: stream W1/W2 tiles over an inner "arbitrary" grid axis.
        fixed = io_bytes + tm_eff * E_pad * (2 + 4) + (2 << 20)
        if h_tile is None:
            h_tile = granule
            for t in range(H_pad, granule - 1, -granule):
                if H_pad % t != 0:
                    continue
                est = fixed + 2 * (2 * E_pad * t * 2) + 2 * tm_eff * t * 4
                if est <= limit_cap:
                    h_tile = t
                    break
        w1p, b1p, w2p = params["w1"], params["b1"], params["w2"]
        H_eff = H_pad
        if H_eff % h_tile != 0:   # forced tile that does not divide H_pad: re-pad weights
            H_eff = _round_up(H_pad, h_tile)
            w1p = jnp.zeros((E_pad, H_eff), jnp.bfloat16).at[:, :H_pad].set(w1p)
            b1p = jnp.zeros((1, H_eff), jnp.float32).at[:, :H_pad].set(b1p)
            w2p = jnp.zeros((H_eff, E_pad), jnp.bfloat16).at[:H_pad, :].set(w2p)
        n_h = H_eff // h_tile
        htiled_est = fixed + 2 * (2 * E_pad * h_tile * 2) + 2 * tm_eff * h_tile * 4
        if vmem_limit_bytes is None:
            vmem_limit_bytes = min(max(int(htiled_est * 1.25), 16 << 20), limit_cap)
        grid = (rows_pad // tm_eff, n_h)
        out2 = pl.pallas_call(
            functools.partial(_ffn_htiled_kernel, e_true=E),
            out_shape=jax.ShapeDtypeStruct((rows_pad, E_pad), x.dtype),
            grid_spec=pltpu.PrefetchScalarGridSpec(
                num_scalar_prefetch=0,
                grid=grid,
                in_specs=[
                    pl.BlockSpec((tm_eff, E_pad), lambda i, h: (i, 0)),   # x rows tile
                    _invariant_spec((1, E_pad), lambda i, h: (0, 0)),     # gamma
                    _invariant_spec((1, E_pad), lambda i, h: (0, 0)),     # beta
                    pl.BlockSpec((E_pad, h_tile), lambda i, h: (0, h)),   # W1 tile (streamed)
                    pl.BlockSpec((1, h_tile), lambda i, h: (0, h)),       # b1 tile
                    pl.BlockSpec((h_tile, E_pad), lambda i, h: (h, 0)),   # W2 tile (streamed)
                    _invariant_spec((1, E_pad), lambda i, h: (0, 0)),     # b2
                ],
                out_specs=pl.BlockSpec((tm_eff, E_pad), lambda i, h: (i, 0)),
                scratch_shapes=[
                    pltpu.VMEM((tm_eff, E_pad), jnp.bfloat16),   # cached LayerNorm output
                    pltpu.VMEM((tm_eff, E_pad), jnp.float32),    # output accumulator
                ],
            ),
            compiler_params=pltpu.CompilerParams(
                dimension_semantics=("parallel", "arbitrary"),
                vmem_limit_bytes=vmem_limit_bytes,
            ),
        )(x2, params["gamma"], params["beta"], w1p, b1p, w2p, params["b2"])

    if rows_pad != rows or E_pad != E:
        out2 = out2[:rows, :E]
    return out2.reshape(B, S, E)


def feed_forward_network(x, gamma, beta, w1, b1, w2, b2, *, tm=256, mode="auto", h_tile=None):
    """Convenience wrapper: prepare params then apply (prefer prepare_ffn_params + ffn_apply
    when calling repeatedly, to avoid re-padding/re-casting the weights every call)."""
    params = prepare_ffn_params(gamma, beta, w1, b1, w2, b2)
    return ffn_apply(x, params, tm=tm, mode=mode, h_tile=h_tile)


def reference_ffn(x, gamma, beta, w1, b1, w2, b2):
    mu = jnp.mean(x, axis=-1, keepdims=True)
    var = jnp.mean((x - mu) ** 2, axis=-1, keepdims=True)
    xn = (x - mu) / jnp.sqrt(var + LN_EPS) * gamma + beta
    h = xn @ w1 + b1
    h = 0.5 * h * (1.0 + lax.erf(h / jnp.sqrt(2.0)))
    return h @ w2 + b2


if __name__ == "__main__":
    # Small shapes consistent with the module: (batch=2, seq=8, embedding_dim=128), mult=4.
    B, S, E = 2, 8, 128
    H = int(E * 4)

    key = jax.random.PRNGKey(0)
    kx, kw1, kb1, kw2, kb2 = jax.random.split(key, 5)

    x = jax.random.normal(kx, (B, S, E), dtype=jnp.float32)

    # Deterministic parameter init (PyTorch-Linear-style uniform +-1/sqrt(fan_in)).
    lim1 = 1.0 / math.sqrt(E)
    lim2 = 1.0 / math.sqrt(H)
    w1 = jax.random.uniform(kw1, (E, H), jnp.float32, -lim1, lim1)   # Linear(E->H) weight.T
    b1 = jax.random.uniform(kb1, (H,), jnp.float32, -lim1, lim1)
    w2 = jax.random.uniform(kw2, (H, E), jnp.float32, -lim2, lim2)   # Linear(H->E) weight.T
    b2 = jax.random.uniform(kb2, (E,), jnp.float32, -lim2, lim2)
    gamma = jnp.ones((E,), jnp.float32)   # LayerNorm weight
    beta = jnp.zeros((E,), jnp.float32)   # LayerNorm bias

    ref = reference_ffn(x, gamma, beta, w1, b1, w2, b2)

    # Pad + bf16-cast the weights once; reuse across calls.
    params = prepare_ffn_params(gamma, beta, w1, b1, w2, b2)

    # Resident-weight fast path.
    out = jax.block_until_ready(ffn_apply(x, params, mode="resident"))
    assert out.shape == (B, S, E)
    # bf16 matmul operands (f32 accumulate) -> loosened tolerance vs the f32 reference.
    assert jnp.allclose(out, ref, atol=2e-2, rtol=2e-2), "resident path mismatch"

    # Large-FFN path (H-tiled weight streaming); forced small h_tile to exercise it here.
    out_t = jax.block_until_ready(ffn_apply(x, params, mode="htiled", h_tile=128))
    assert out_t.shape == (B, S, E)
    assert jnp.allclose(out_t, ref, atol=2e-2, rtol=2e-2), "h-tiled path mismatch"

    print("KERNEL_OK")
</pallas_src>

<mosaic_0001>
module attributes {stable_mosaic.version = 11 : i64} {
  func.func @k(%arg0: i32, %arg1: memref<8x128xf32, #tpu.memory_space<vmem>>, %arg2: memref<8x128xf32, #tpu.memory_space<vmem>>, %arg3: memref<8x128xf32, #tpu.memory_space<vmem>>) attributes {dimension_semantics = [#tpu.dimension_semantics<arbitrary>], iteration_bounds = array<i64: 2>, scalar_prefetch = 0 : i64, scratch_operands = 0 : i64, tpu.core_type = #tpu.core_type<tc>, window_params = [{pipeline_mode = #tpu.pipeline_mode<synchronous>, transform_indices = @transform_0, window_bounds = array<i64: 8, 128>}, {transform_indices = @transform_1, window_bounds = array<i64: 8, 128>}, {transform_indices = @transform_2, window_bounds = array<i64: 8, 128>}]} {
    %c0 = arith.constant 0 : index
    %c0_0 = arith.constant 0 : index
    %0 = vector.load %arg1[%c0, %c0_0] : memref<8x128xf32, #tpu.memory_space<vmem>>, vector<8x128xf32>
    %c0_1 = arith.constant 0 : index
    %c0_2 = arith.constant 0 : index
    %1 = vector.load %arg2[%c0_1, %c0_2] : memref<8x128xf32, #tpu.memory_space<vmem>>, vector<8x128xf32>
    %2 = arith.addf %0, %1 : vector<8x128xf32>
    %c0_3 = arith.constant 0 : index
    %c0_4 = arith.constant 0 : index
    %3 = vector.load %arg3[%c0_3, %c0_4] : memref<8x128xf32, #tpu.memory_space<vmem>>, vector<8x128xf32>
    tpu.vector_store %arg3[%c0_3, %c0_4], %2 {strides = array<i32>} : memref<8x128xf32, #tpu.memory_space<vmem>>, vector<8x128xf32>,
    return
  }
  func.func @transform_0(%arg0: i32) -> (i32, i32) {
    %c0_i32 = arith.constant 0 : i32
    %c0_i32_0 = arith.constant 0 : i32
    %c0_i32_1 = arith.constant 0 : i32
    return %c0_i32, %c0_i32_0 : i32, i32
  }
  func.func @transform_1(%arg0: i32) -> (i32, i32) {
    %c0_i32 = arith.constant 0 : i32
    %c0_i32_0 = arith.constant 0 : i32
    return %arg0, %c0_i32 : i32, i32
  }
  func.func @transform_2(%arg0: i32) -> (i32, i32) {
    %c0_i32 = arith.constant 0 : i32
    %c0_i32_0 = arith.constant 0 : i32
    return %arg0, %c0_i32 : i32, i32
  }
}

module attributes {stable_mosaic.version = 11 : i64} {
  func.func @_ffn_resident_kernel(%arg0: i32, %arg1: memref<16x128xf32, #tpu.memory_space<vmem>>, %arg2: memref<1x128xf32, #tpu.memory_space<vmem>>, %arg3: memref<1x128xf32, #tpu.memory_space<vmem>>, %arg4: memref<128x512xbf16, #tpu.memory_space<vmem>>, %arg5: memref<1x512xf32, #tpu.memory_space<vmem>>, %arg6: memref<512x128xbf16, #tpu.memory_space<vmem>>, %arg7: memref<1x128xf32, #tpu.memory_space<vmem>>, %arg8: memref<16x128xf32, #tpu.memory_space<vmem>>) attributes {dimension_semantics = [#tpu.dimension_semantics<parallel>], iteration_bounds = array<i64: 1>, scalar_prefetch = 0 : i64, scratch_operands = 0 : i64, tpu.core_type = #tpu.core_type<tc>, window_params = [{transform_indices = @transform_0, window_bounds = array<i64: 16, 128>}, {pipeline_mode = #tpu.pipeline_mode<synchronous>, transform_indices = @transform_1, window_bounds = array<i64: 1, 128>}, {pipeline_mode = #tpu.pipeline_mode<synchronous>, transform_indices = @transform_2, window_bounds = array<i64: 1, 128>}, {pipeline_mode = #tpu.pipeline_mode<synchronous>, transform_indices = @transform_3, window_bounds = array<i64: 128, 512>}, {pipeline_mode = #tpu.pipeline_mode<synchronous>, transform_indices = @transform_4, window_bounds = array<i64: 1, 512>}, {pipeline_mode = #tpu.pipeline_mode<synchronous>, transform_indices = @transform_5, window_bounds = array<i64: 512, 128>}, {pipeline_mode = #tpu.pipeline_mode<synchronous>, transform_indices = @transform_6, window_bounds = array<i64: 1, 128>}, {transform_indices = @transform_7, window_bounds = array<i64: 16, 128>}]} {
    %c0 = arith.constant 0 : index
    %c0_0 = arith.constant 0 : index
    %0 = vector.load %arg2[%c0, %c0_0] : memref<1x128xf32, #tpu.memory_space<vmem>>, vector<1x128xf32>
    %c0_1 = arith.constant 0 : index
    %c0_2 = arith.constant 0 : index
    %1 = vector.load %arg3[%c0_1, %c0_2] : memref<1x128xf32, #tpu.memory_space<vmem>>, vector<1x128xf32>
    %c0_3 = arith.constant 0 : index
    %c0_4 = arith.constant 0 : index
    %2 = vector.load %arg5[%c0_3, %c0_4] : memref<1x512xf32, #tpu.memory_space<vmem>>, vector<1x512xf32>
    %c0_5 = arith.constant 0 : index
    %c0_6 = arith.constant 0 : index
    %3 = vector.load %arg7[%c0_5, %c0_6] : memref<1x128xf32, #tpu.memory_space<vmem>>, vector<1x128xf32>
    %c0_7 = arith.constant 0 : index
    %c0_8 = arith.constant 0 : index
    %4 = vector.load %arg4[%c0_7, %c0_8] : memref<128x512xbf16, #tpu.memory_space<vmem>>, vector<128x512xbf16>
    %c0_9 = arith.constant 0 : index
    %c0_10 = arith.constant 0 : index
    %5 = vector.load %arg6[%c0_9, %c0_10] : memref<512x128xbf16, #tpu.memory_space<vmem>>, vector<512x128xbf16>
    %c0_11 = arith.constant 0 : index
    %c0_12 = arith.constant 0 : index
    %6 = vector.load %arg1[%c0_11, %c0_12] : memref<16x128xf32, #tpu.memory_space<vmem>>, vector<16x128xf32>
    %cst = arith.constant dense<0.000000e+00> : vector<16xf32>
    %7 = vector.multi_reduction <add>, %6, %cst [1] : vector<16x128xf32> to vector<16xf32>
    %8 = vector.shape_cast %7 : vector<16xf32> to vector<16x1xf32>
    %9 = arith.mulf %6, %6 : vector<16x128xf32>
    %cst_13 = arith.constant dense<0.000000e+00> : vector<16xf32>
    %10 = vector.multi_reduction <add>, %9, %cst_13 [1] : vector<16x128xf32> to vector<16xf32>
    %11 = vector.shape_cast %10 : vector<16xf32> to vector<16x1xf32>
    %cst_14 = arith.constant 7.812500e-03 : f32
    %12 = vector.broadcast %cst_14 : f32 to vector<16x1xf32>
    %13 = arith.mulf %8, %12 : vector<16x1xf32>
    %cst_15 = arith.constant 7.812500e-03 : f32
    %14 = vector.broadcast %cst_15 : f32 to vector<16x1xf32>
    %15 = arith.mulf %11, %14 : vector<16x1xf32>
    %16 = arith.mulf %13, %13 : vector<16x1xf32>
    %17 = arith.subf %15, %16 : vector<16x1xf32>
    %18 = vector.broadcast %13 : vector<16x1xf32> to vector<16x128xf32>
    %19 = arith.subf %6, %18 : vector<16x128xf32>
    %cst_16 = arith.constant 9.99999974E-6 : f32
    %20 = vector.broadcast %cst_16 : f32 to vector<16x1xf32>
    %21 = arith.addf %17, %20 : vector<16x1xf32>
    %22 = math.rsqrt %21 : vector<16x1xf32>
    %23 = vector.broadcast %22 : vector<16x1xf32> to vector<16x128xf32>
    %24 = arith.mulf %19, %23 : vector<16x128xf32>
    %25 = vector.broadcast %0 : vector<1x128xf32> to vector<16x128xf32>
    %26 = arith.mulf %24, %25 : vector<16x128xf32>
    %27 = vector.broadcast %1 : vector<1x128xf32> to vector<16x128xf32>
    %28 = arith.addf %26, %27 : vector<16x128xf32>
    %29 = arith.truncf %28 : vector<16x128xf32> to vector<16x128xbf16>
    %cst_17 = arith.constant dense<0.000000e+00> : vector<16x512xf32>
    %30 = tpu.matmul %29, %4, %cst_17 {dimension_numbers = #tpu.dot_dimension_numbers<[1], [0], [0], [1], [0, 0, 1, 1], [], []>} : vector<16x128xbf16>, vector<128x512xbf16>, vector<16x512xf32> -> vector<16x512xf32>
    %31 = vector.broadcast %2 : vector<1x512xf32> to vector<16x512xf32>
    %32 = arith.addf %30, %31 : vector<16x512xf32>
    %cst_18 = arith.constant 5.000000e-01 : f32
    %33 = vector.broadcast %cst_18 : f32 to vector<16x512xf32>
    %34 = arith.mulf %33, %32 : vector<16x512xf32>
    %cst_19 = arith.constant 0.707106769 : f32
    %35 = vector.broadcast %cst_19 : f32 to vector<16x512xf32>
    %36 = arith.mulf %32, %35 : vector<16x512xf32>
    %37 = math.erf %36 : vector<16x512xf32>
    %cst_20 = arith.constant 1.000000e+00 : f32
    %38 = vector.broadcast %cst_20 : f32 to vector<16x512xf32>
    %39 = arith.addf %38, %37 : vector<16x512xf32>
    %40 = arith.mulf %34, %39 : vector<16x512xf32>
    %41 = arith.truncf %40 : vector<16x512xf32> to vector<16x512xbf16>
    %cst_21 = arith.constant dense<0.000000e+00> : vector<16x128xf32>
    %42 = tpu.matmul %41, %5, %cst_21 {dimension_numbers = #tpu.dot_dimension_numbers<[1], [0], [0], [1], [0, 0, 1, 1], [], []>} : vector<16x512xbf16>, vector<512x128xbf16>, vector<16x128xf32> -> vector<16x128xf32>
    %43 = vector.broadcast %3 : vector<1x128xf32> to vector<16x128xf32>
    %44 = arith.addf %42, %43 : vector<16x128xf32>
    %c0_22 = arith.constant 0 : index
    %c0_23 = arith.constant 0 : index
    %45 = vector.load %arg8[%c0_22, %c0_23] : memref<16x128xf32, #tpu.memory_space<vmem>>, vector<16x128xf32>
    tpu.vector_store %arg8[%c0_22, %c0_23], %44 {strides = array<i32>} : memref<16x128xf32, #tpu.memory_space<vmem>>, vector<16x128xf32>,
    return
  }
  func.func @transform_0(%arg0: i32) -> (i32, i32) {
    %c0_i32 = arith.constant 0 : i32
    %c0_i32_0 = arith.constant 0 : i32
    return %arg0, %c0_i32 : i32, i32
  }
  func.func @transform_1(%arg0: i32) -> (i32, i32) {
    %c0_i32 = arith.constant 0 : i32
    %c0_i32_0 = arith.constant 0 : i32
    %c0_i32_1 = arith.constant 0 : i32
    return %c0_i32, %c0_i32_0 : i32, i32
  }
  func.func @transform_2(%arg0: i32) -> (i32, i32) {
    %c0_i32 = arith.constant 0 : i32
    %c0_i32_0 = arith.constant 0 : i32
    %c0_i32_1 = arith.constant 0 : i32
    return %c0_i32, %c0_i32_0 : i32, i32
  }
  func.func @transform_3(%arg0: i32) -> (i32, i32) {
    %c0_i32 = arith.constant 0 : i32
    %c0_i32_0 = arith.constant 0 : i32
    %c0_i32_1 = arith.constant 0 : i32
    return %c0_i32, %c0_i32_0 : i32, i32
  }
  func.func @transform_4(%arg0: i32) -> (i32, i32) {
    %c0_i32 = arith.constant 0 : i32
    %c0_i32_0 = arith.constant 0 : i32
    %c0_i32_1 = arith.constant 0 : i32
    return %c0_i32, %c0_i32_0 : i32, i32
  }
  func.func @transform_5(%arg0: i32) -> (i32, i32) {
    %c0_i32 = arith.constant 0 : i32
    %c0_i32_0 = arith.constant 0 : i32
    %c0_i32_1 = arith.constant 0 : i32
    return %c0_i32, %c0_i32_0 : i32, i32
  }
  func.func @transform_6(%arg0: i32) -> (i32, i32) {
    %c0_i32 = arith.constant 0 : i32
    %c0_i32_0 = arith.constant 0 : i32
    %c0_i32_1 = arith.constant 0 : i32
    return %c0_i32, %c0_i32_0 : i32, i32
  }
  func.func @transform_7(%arg0: i32) -> (i32, i32) {
    %c0_i32 = arith.constant 0 : i32
    %c0_i32_0 = arith.constant 0 : i32
    return %arg0, %c0_i32 : i32, i32
  }
}

</mosaic_0001>

<bundles_post_ra>
// kernel: tpu_custom_call.1
= control target key start
LH: loop header
LB: loop body
LE: loop exit
PB: predicated region body
PF: predicated region fallthrough
CT: control target
= control target key end

     0   :  { %7 = vsyncpa [#allocation3], 0  ;;  %s692_s0 = inlined_call_operand.hbm [shape: f32[8,128], index: 0, kind: input, shape index: {}]   ;;  %s693_s1 = inlined_call_operand.hbm [shape: f32[16,128], index: 1, kind: input, shape index: {}]   ;;  %s694_s2 = inlined_call_operand.hbm [shape: f32[16,128], index: 2, kind: output, shape index: {}]  }
   0x1   :  { %8 = vsyncpa [#allocation6], 0 }
   0x2   :  { %10 = vsyncpa [#allocation6 + $0x1], 0 }
   0x3   :  { %11 = vsyncpa [#allocation4], 0 }
   0x4   :  { %13 = vsyncpa [#allocation4 + $0x1], 0  ;;  %s491_s9 = smov 0   ;;  %s493_s10 = smov 0  }
   0x5   :  { %s495_s11 = smov 0   ;;  %s497_s12 = smov 0  }
   0x6 LB: > { %s512_s13 = sadd.s32 4294967295, %s471_s12   ;;  %s272_s14 = sadd.s32 4294967294, %s471_s12   ;;  %s471_s12 = sphi %s497_s12, %s718_s12   ;;  %s467_s11 = sphi %s495_s11, %s717_s11   ;;  %s463_s10 = sphi %s493_s10, %s716_s10   ;;  %s459_s9 = sphi %s491_s9, %s715_s9  }
   0x7   : > { %p60_p0 = scmp.ne.s32.totalorder %s463_s10, %s459_s9  ;;  %p695_p1 = scmp.eq.s32.totalorder %s512_s13, 0 }
   0x8   : > { %p90_p3 = scmp.eq.s32.totalorder %s272_s14, 1  ;;  %p273_p5 = scmp.ge.s32.totalorder %s471_s12, 1 }
   0x9   : > { %p521_p4 = por %p695_p1, %p60_p0  ;;  %p97_p7 = scmp.lt.s32.totalorder %s471_s12, 3 }
   0xa   : > { %p526_p6 = por %p90_p3, %p60_p0  ;;  %s473_s18 = smov [#allocation2]  }
   0xb   : > { %s698_s15 = scalar_select %p521_p4, 1, 0 }
   0xc   : > { %s699_s16 = scalar_select %p526_p6, 1, 0 }
   0xd   : > { %p531_p8 = pnand %p273_p5, %p97_p7  ;;  %s110_s19 = sshll.u32 %s473_s18, 4  ;;  %s111_s19 = int_to_ptr.vmem [resolvable:$true] %s110_s19 }
   0xe   : > { %s539_s20 = sadd.s32 1, %s471_s12   ;;  %s47_s24 = sadd.s32 1, %s467_s11 }
   0xf   : > { %s700_s17 = scalar_select %p531_p8, 1, 0 }
  0x10   : > { %p294_p10 = pneg %p531_p8  ;;  %s44_s22 = ssub.s32 %s471_s12, %s539_s20 }
  0x11   : > { %p549_p12 = scmp.eq.s32.totalorder %s44_s22, 0  ;;  %s343_s27 = scalar_lea.hbm %s692_s0, 128 }
  0x12   : > { %p543_p11 = pnand %p294_p10, %p695_p1  ;;  %p344_p0 = scmp.ne.s32.totalorder %s692_s0, %s343_s27 }
  0x13   : > { %s702_s23 = scalar_select %p549_p12, 1, 0 }
  0x14   : > { %p345_p3 = pneg %p543_p11  ;;  %p350_p10 = scmp.lt.u32.totalorder %s343_s27, %s692_s0 }
  0x16   : > { %p346_p5 = pnand %p345_p3, %p344_p0 }
  0x18   : > { %p347_p7 = pneg %p346_p5 }
  0x1a   : > { %p352_p9 = pnand %p350_p10, %p347_p7 }
  0x1c   : > { %355 = shalt.err (!%p352_p9)
}
  0x1d   : > { %s356_s4 = scalar_lea.vmem %s111_s19, 128  ;;  %p364_p6 = scmp.lt.s32.totalorder %s111_s19, %s111_s19 }
  0x1e   : > { %p357_p1 = scmp.ne.s32.totalorder %s111_s19, %s356_s4  ;;  %p365_p4 = scmp.lt.s32.totalorder %s356_s4, %s356_s4 }
  0x20   : > { %p359_p2 = pnand %p357_p1, %p345_p3  ;;  %p366_p8 = por %p365_p4, %p364_p6 }
  0x22   : > { %p360_p13 = pneg %p359_p2 }
  0x24   : > { %p367_p12 = pnand %p366_p8, %p360_p13 }
  0x26   : > { %370 = shalt.err (!%p367_p12)
}
  0x27   : > { %297 = dma.hbm_to_vmem [thread:$0]  (!%p543_p11), %s692_s0, 128, %s111_s19, [#allocation3]  }
  0x28   : > { %p703_p1 = scmp.ne.s32.totalorder %s702_s23, 0  ;;  %p55_p2 = scmp.eq.s32.totalorder %s471_s12, 0 }
  0x29   : > { %p704_p4 = scmp.ne.s32.totalorder %s467_s11, %s463_s10  ;;  %p705_p6 = scmp.eq.s32.totalorder %s512_s13, 1 }
  0x2a   : > { %s575_s7 = scalar_select %p703_p1, %s467_s11, %s47_s24  }
  0x2b   : > { %p583_p8 = por %p705_p6, %p704_p4  ;;  %p307_p9 = scmp.lt.s32.totalorder %s471_s12, 2 }
  0x2c   : > { %s121_s14 = sand.u32 1, %s467_s11   ;;  %p707_p12 = pmov %p704_p4 }
  0x2d   : > { %s276_s18 = sshll.u32 %s121_s14, 3  ;;  %s277_s21 = sshll.u32 %s471_s12, 7 }
  0x2e   : > { %p56_p13 = por %p55_p2, %p707_p12  ;;  %s596_s19 = scalar_lea.hbm %s693_s1, %s277_s21 }
  0x2f   : > { %s125_s23 = scalar_lea.vmem [#allocation5], %s276_s18  ;;  %s122_s27 = scalar_lea.sflag [#allocation6], %s121_s14 }
  0x30   : > { %s132_s24 = sshll.u32 %s125_s23, 4  ;;  %p598_p11 = pnand %p307_p9, %p56_p13  ;;  %s602_s24 = int_to_ptr.vmem [resolvable:$true] %s132_s24 }
  0x31   : > { %s371_s28 = scalar_lea.hbm %s596_s19, 128  ;;  %s376_s3 = scalar_lea.hbm %s693_s1, 256 }
  0x32   : > { %p372_p0 = scmp.ne.s32.totalorder %s596_s19, %s371_s28  ;;  %p373_p3 = pneg %p598_p11 }
  0x33   : > { %p377_p10 = scmp.lt.u32.totalorder %s596_s19, %s693_s1  ;;  %p378_p1 = scmp.lt.u32.totalorder %s376_s3, %s371_s28 }
  0x34   : > { %p374_p5 = pnand %p373_p3, %p372_p0  ;;  %p380_p4 = scmp.lt.u32.totalorder %s371_s28, %s596_s19 }
  0x35   : > { %p379_p2 = por %p378_p1, %p377_p10 }
  0x36   : > { %p375_p7 = pneg %p374_p5 }
  0x37   : > { %p381_p6 = por %p380_p4, %p379_p2 }
  0x39   : > { %p382_p9 = pnand %p381_p6, %p375_p7 }
  0x3b   : > { %385 = shalt.err (!%p382_p9)
}
  0x3c   : > { %s386_s6 = scalar_lea.vmem %s602_s24, 128  ;;  %s474_s14 = smov [#allocation5]  }
  0x3d   : > { %p387_p12 = scmp.ne.s32.totalorder %s602_s24, %s386_s6  ;;  %s391_s18 = sshll.u32 %s474_s14, 4  ;;  %s392_s18 = int_to_ptr.vmem [resolvable:$false] %s391_s18 }
  0x3e   : > { %s393_s21 = scalar_lea.vmem %s392_s18, 256  ;;  %p394_p5 = scmp.lt.s32.totalorder %s602_s24, %s392_s18 }
  0x3f   : > { %p389_p13 = pnand %p387_p12, %p373_p3  ;;  %p395_p10 = scmp.lt.s32.totalorder %s393_s21, %s386_s6 }
  0x41   : > { %p390_p0 = pneg %p389_p13  ;;  %p396_p1 = por %p395_p10, %p394_p5 }
  0x43   : > { %p397_p2 = pnand %p396_p1, %p390_p0 }
  0x45   : > { %400 = shalt.err (!%p397_p2)
}
  0x46   : > { %301 = dma.hbm_to_vmem [thread:$0]  (!%p598_p11), %s596_s19, 128, %s602_s24, %s122_s27  }
  0x47   : > { %p709_p7 = scmp.ne.s32.totalorder %s700_s17, 0 }
  0x48   : > { %p710_p3 = scmp.eq.s32.totalorder (!%p709_p7), %s512_s13, 0 }
  0x49   : > { %141 = sbr.rel (%p709_p7) target bundleno = 110 (0x6e), region = 28 }
  0x50   : > { %446 = dma.done.wait (%p710_p3), [#allocation3], 128   ;;  %p711_p4 = pmov %p710_p3 }
  0x51   : > { %s636_s22 = sand.u32 1, %s463_s10   ;;  %p712_p6 = scmp.ne.s32.totalorder %s698_s15, 0 }
  0x52   : > { %448 = vsyncadd (%p711_p4), [#allocation3], 4294967168  ;;  %s280_s25 = sshll.u32 %s636_s22, 3  ;;  %s148_s23 = scalar_lea.sflag [#allocation6], %s636_s22 }
  0x53   : > { %s151_s26 = scalar_lea.vmem [#allocation5], %s280_s25 }
  0x54   : > { %450 = dma.done.wait (%p712_p6), %s148_s23, 128  }
  0x55   : > { %452 = vsyncadd (%p712_p6), %s148_s23, 4294967168  ;;  %s171_s17 = scalar_lea.vmem [#allocation7], %s280_s25  ;;  %s283_s24 = sshll.u32 %s512_s13, 7  ;;  %v172_v0 = vld [vmem:[#allocation2] sm:$0xff]  ;;  %v173_v1 = vld [vmem:[%s151_s26] sm:$0xff] }
  0x56   : > { %s190_s19 = sshll.u32 %s171_s17, 4  ;;  %v174_v2 = vadd.f32 %v173_v1, %v172_v0  ;;  %s650_s29 = scalar_lea.hbm %s694_s2, %s283_s24  ;;  %s645_s19 = int_to_ptr.vmem [resolvable:$true] %s190_s19 }
  0x57   : > { %s177_s15 = scalar_lea.sflag [#allocation4], %s636_s22  ;;  %s401_s30 = scalar_lea.vmem %s645_s19, 128 }
  0x58   : > { %175 = vst [vmem:[%s171_s17] sm:$0xff] %v174_v2  ;;  %p402_p11 = scmp.ne.s32.totalorder %s645_s19, %s401_s30  ;;  %s475_s13 = smov [#allocation7]  }
  0x59   : > { %s405_s3 = sshll.u32 %s475_s13, 4  ;;  %s406_s3 = int_to_ptr.vmem [resolvable:$false] %s405_s3 }
  0x5a   : > { %p403_p9 = pnand %p402_p11, %p583_p8  ;;  %s407_s4 = scalar_lea.vmem %s406_s3, 256 }
  0x5b   : > { %p408_p13 = scmp.lt.s32.totalorder %s645_s19, %s406_s3  ;;  %p409_p0 = scmp.lt.s32.totalorder %s407_s4, %s401_s30 }
  0x5c   : > { %p404_p12 = pneg %p403_p9 }
  0x5d   : > { %p410_p5 = por %p409_p0, %p408_p13 }
  0x5f   : > { %p411_p10 = pnand %p410_p5, %p404_p12 }
  0x61   : > { %414 = shalt.err (!%p411_p10)
}
  0x62   : > { %s415_s5 = scalar_lea.hbm %s650_s29, 128  ;;  %s419_s18 = scalar_lea.hbm %s694_s2, 256 }
  0x63   : > { %p416_p1 = scmp.ne.s32.totalorder %s650_s29, %s415_s5  ;;  %p420_p3 = scmp.lt.u32.totalorder %s650_s29, %s694_s2 }
  0x64   : > { %p421_p4 = scmp.lt.u32.totalorder %s419_s18, %s415_s5  ;;  %p423_p11 = scmp.lt.u32.totalorder %s415_s5, %s650_s29 }
  0x65   : > { %p417_p2 = pnand %p416_p1, %p583_p8 }
  0x66   : > { %p422_p6 = por %p421_p4, %p420_p3 }
  0x67   : > { %p418_p7 = pneg %p417_p2 }
  0x68   : > { %p424_p9 = por %p423_p11, %p422_p6 }
  0x6a   : > { %p425_p12 = pnand %p424_p9, %p418_p7 }
  0x6c   : > { %428 = shalt.err (!%p425_p12)
}
  0x6d   : > { %292 = dma.vmem_to_hbm [thread:$0]  (%p583_p8), %s645_s19, 128, %s650_s29, %s177_s15  }
  0x6e PF: > { %s202_s25 = sand.u32 1, %s459_s9   ;;  %p713_p13 = scmp.ne.s32.totalorder %s699_s16, 0 }
  0x6f   : > { %p714_p0 = scmp.ge.s32.totalorder %s471_s12, 2  ;;  %s203_s23 = scalar_lea.sflag [#allocation4], %s202_s25 }
  0x71   : > { %p303_p5 = pnand %p714_p0, %p713_p13 }
  0x73   : > { %454 = dma.done.wait (!%p303_p5), %s203_s23, 128  }
  0x74   : > { %456 = vsyncadd (!%p303_p5), %s203_s23, 4294967168  ;;  %p16_p10 = scmp.ge.s32.totalorder %s539_s20, 4   ;;  %s715_s9 = smov %s463_s10 }
  0x75   : > { %s716_s10 = smov %s467_s11  ;;  %s717_s11 = smov %s575_s7 }
  0x76   : > { %s718_s12 = smov %s539_s20  ;;  %18 = sbr.rel (!%p16_p10) target bundleno = 6 (0x6), region = 78 }
  0x7d   :  { %208 = vsyncpa [#allocation3], 1 }
  0x7e   :  { %210 = vsyncpa [#allocation3 + $0x1], 1 }
  0x7f   :  { %211 = vsyncpa [#allocation6], 1 }
  0x80   :  { %213 = vsyncpa [#allocation6 + $0x1], 1 }
  0x81   :  { %214 = vsyncpa [#allocation4], 1 }
  0x82   :  { %216 = vsyncpa [#allocation4 + $0x1], 1 }

// kernel: tpu_custom_call.1
= control target key start
LH: loop header
LB: loop body
LE: loop exit
PB: predicated region body
PF: predicated region fallthrough
CT: control target
= control target key end

     0   :  { %12 = vsyncpa [#allocation3], 0  ;;  %s1270_s0 = inlined_call_operand.hbm [shape: f32[16,128], index: 0, kind: input, shape index: {}]   ;;  %s1271_s1 = inlined_call_operand.vmem [shape: f32[1,128], index: 1, kind: input, shape index: {}]   ;;  %s1272_s2 = inlined_call_operand.vmem [shape: f32[1,128], index: 2, kind: input, shape index: {}]   ;;  %s1273_s3 = inlined_call_operand.hbm [shape: bf16[128,512], index: 3, kind: input, shape index: {}]   ;;  %s1274_s4 = inlined_call_operand.vmem [shape: f32[1,512], index: 4, kind: input, shape index: {}]   ;;  %s1275_s5 = inlined_call_operand.hbm [shape: bf16[512,128], index: 5, kind: input, shape index: {}]   ;;  %s1276_s6 = inlined_call_operand.vmem [shape: f32[1,128], index: 6, kind: input, shape index: {}]   ;;  %s1277_s7 = inlined_call_operand.hbm [shape: f32[16,128], index: 7, kind: output, shape index: {}]  }
   0x1   :  { %13 = vsyncpa [#allocation6], 0 }
   0x2   :  { %14 = vsyncpa [#allocation4], 0  ;;  %s1141_s24 = smov [#allocation5]   ;;  %s1047_s28 = scalar_lea.hbm %s1273_s3, 4096 }
   0x3   :  { %s36_s25 = sshll.u32 %s1141_s24, 4  ;;  %p1048_p0 = scmp.ne.s32.totalorder %s1273_s3, %s1047_s28  ;;  %s37_s25 = int_to_ptr.vmem [resolvable:$true] %s36_s25 }
   0x4   :  { %p1051_p1 = scmp.lt.u32.totalorder %s1047_s28, %s1273_s3 }
   0x6   :  { %p1053_p2 = pnand %p1051_p1, %p1048_p0 }
   0x8   :  { %1056 = shalt.err (!%p1053_p2)
}
   0x9   :  { %s1057_s10 = scalar_lea.vmem %s37_s25, 4096  ;;  %p1062_p4 = scmp.lt.s32.totalorder %s37_s25, %s37_s25 }
   0xa   :  { %p1058_p3 = scmp.ne.s32.totalorder %s37_s25, %s1057_s10  ;;  %p1063_p5 = scmp.lt.s32.totalorder %s1057_s10, %s1057_s10 }
   0xc   :  { %p1064_p6 = por %p1063_p5, %p1062_p4 }
   0xe   :  { %p1065_p7 = pnand %p1064_p6, %p1058_p3 }
  0x10   :  { %1068 = shalt.err (!%p1065_p7)
}
  0x11   :  { %s1142_s11 = smov 256   ;;  %s1143_s12 = smov 16  }
  0x12   :  { %42 = dma.hbm_to_vmem [thread:$0]  %s1273_s3, 4096, %s37_s25, [#allocation6], %s1142_s11, %s1142_s11, %s1143_s12  }
  0x13   :  { %s1144_s15 = smov [#allocation2]   ;;  %s1069_s19 = scalar_lea.hbm %s1270_s0, 256 }
  0x14   :  { %s20_s16 = sshll.u32 %s1144_s15, 4  ;;  %p1070_p8 = scmp.ne.s32.totalorder %s1270_s0, %s1069_s19  ;;  %s21_s16 = int_to_ptr.vmem [resolvable:$true] %s20_s16 }
  0x15   :  { %p1073_p9 = scmp.lt.u32.totalorder %s1069_s19, %s1270_s0 }
  0x17   :  { %p1075_p10 = pnand %p1073_p9, %p1070_p8 }
  0x19   :  { %1078 = shalt.err (!%p1075_p10)
}
  0x1a   :  { %s1079_s24 = scalar_lea.vmem %s21_s16, 256  ;;  %p1084_p12 = scmp.lt.s32.totalorder %s21_s16, %s21_s16 }
  0x1b   :  { %p1080_p11 = scmp.ne.s32.totalorder %s21_s16, %s1079_s24  ;;  %p1085_p13 = scmp.lt.s32.totalorder %s1079_s24, %s1079_s24 }
  0x1d   :  { %p1086_p0 = por %p1085_p13, %p1084_p12 }
  0x1f   :  { %p1087_p1 = pnand %p1086_p0, %p1080_p11 }
  0x21   :  { %1090 = shalt.err (!%p1087_p1)
}
  0x22   :  { %s1145_s3 = smov 128   ;;  %s1146_s25 = smov 8  }
  0x23   :  { %26 = dma.hbm_to_vmem [thread:$0]  %s1270_s0, 256, %s21_s16, [#allocation3], %s1145_s3, %s1145_s3, %s1146_s25  }
  0x24   :  { %s1147_s28 = smov [#allocation7]   ;;  %s1091_s9 = scalar_lea.hbm %s1275_s5, 4096 }
  0x25   :  { %s50_s29 = sshll.u32 %s1147_s28, 4  ;;  %p1092_p2 = scmp.ne.s32.totalorder %s1275_s5, %s1091_s9  ;;  %s51_s29 = int_to_ptr.vmem [resolvable:$true] %s50_s29 }
  0x26   :  { %p1095_p3 = scmp.lt.u32.totalorder %s1091_s9, %s1275_s5 }
  0x28   :  { %p1097_p4 = pnand %p1095_p3, %p1092_p2 }
  0x2a   :  { %1100 = shalt.err (!%p1097_p4)
}
  0x2b   :  { %s1101_s14 = scalar_lea.vmem %s51_s29, 4096  ;;  %p1106_p6 = scmp.lt.s32.totalorder %s51_s29, %s51_s29 }
  0x2c   :  { %p1102_p5 = scmp.ne.s32.totalorder %s51_s29, %s1101_s14  ;;  %p1107_p7 = scmp.lt.s32.totalorder %s1101_s14, %s1101_s14 }
  0x2e   :  { %p1108_p8 = por %p1107_p7, %p1106_p6 }
  0x30   :  { %p1109_p9 = pnand %p1108_p8, %p1102_p5 }
  0x32   :  { %1112 = shalt.err (!%p1109_p9)
}
  0x33   :  { %s1148_s0 = smov 64   ;;  %s1149_s15 = smov 4  }
  0x34   :  { %56 = dma.hbm_to_vmem [thread:$0]  %s1275_s5, 4096, %s51_s29, [#allocation6], %s1148_s0, %s1148_s0, %s1149_s15  }
  0x35   :  { %1135 = dma.done.wait [#allocation3], 256  }
  0x36   :  { %1136 = vsyncadd [#allocation3], 4294967040 }
  0x37   :  { %1137 = dma.done.wait [#allocation6], 8192  }
  0x38   :  { %1138 = vsyncadd [#allocation6], 4294959104  ;;  %v1231_v0 = vld [vmem:[#allocation2] sm:$0xff]  ;;  %v1233_v1 = vld [vmem:[#allocation2 + $0x8] sm:$0xff]  ;;  %v1150_v32 = vmov 0   ;;  %s1151_s22 = smov [#allocation8]  }
  0x39   :  { %171 = vadd.xlane.f32.xlu0 %v1231_v0  ;;  %v175_v2 = vmul.f32 %v1231_v0, %v1231_v0  ;;  %v176_v3 = vmul.f32 %v1233_v1, %v1233_v1  ;;  %v947_v4 = vld [vmem:[#allocation5 + $0x4] ss:$16 sps:$4 sm:$0xff]   ;;  %v949_v5 = vld [vmem:[#allocation5 + $0xc] ss:$16 sps:$4 sm:$0xff]   ;;  %v951_v6 = vld [vmem:[#allocation5] ss:$16 sps:$4 sm:$0xff]   ;;  %427 = vmatprep.mubr.bf16.mxu0 %v1150_v32 }
  0x3a   :  { %v952_v7 = vld [vmem:[#allocation5 + $0x8] ss:$16 sps:$4 sm:$0xff]   ;;  %395 = vmatprep.subr.bf16.mxu0 %v947_v4  ;;  %438 = vmatprep.subr.bf16.mxu1 %v949_v5  ;;  %v953_v8 = vld [vmem:[#allocation5 + $0x24] ss:$16 sps:$4 sm:$0xff]   ;;  %v955_v9 = vld [vmem:[#allocation5 + $0x2c] ss:$16 sps:$4 sm:$0xff]  }
  0x3b   :  { %177 = vadd.xlane.f32.xlu1 %v175_v2  ;;  %396 = vmatpush1.bf16.msra.mxu0 %v951_v6  ;;  %v957_v10 = vld [vmem:[#allocation5 + $0x20] ss:$16 sps:$4 sm:$0xff]   ;;  %v958_v11 = vld [vmem:[#allocation5 + $0x28] ss:$16 sps:$4 sm:$0xff]   ;;  %v959_v12 = vld [vmem:[#allocation5 + $0x44] ss:$16 sps:$4 sm:$0xff]  }
  0x3c   :  { %439 = vmatpush1.bf16.msra.mxu1 %v952_v7  ;;  %397 = vmatprep.subr.bf16.mxu0 %v953_v8  ;;  %v961_v13 = vld [vmem:[#allocation5 + $0x4c] ss:$16 sps:$4 sm:$0xff]   ;;  %v963_v14 = vld [vmem:[#allocation5 + $0x40] ss:$16 sps:$4 sm:$0xff]   ;;  %v964_v15 = vld [vmem:[#allocation5 + $0x48] ss:$16 sps:$4 sm:$0xff]  }
  0x3d   :  { %173 = vadd.xlane.f32.xlu0 %v1233_v1  ;;  %440 = vmatprep.subr.bf16.mxu1 %v955_v9  ;;  %v965_v16 = vld [vmem:[#allocation5 + $0x64] ss:$16 sps:$4 sm:$0xff]   ;;  %v967_v17 = vld [vmem:[#allocation5 + $0x6c] ss:$16 sps:$4 sm:$0xff]   ;;  %v969_v18 = vld [vmem:[#allocation5 + $0x60] ss:$16 sps:$4 sm:$0xff]  }
  0x3e   :  { %v970_v19 = vld [vmem:[#allocation5 + $0x68] ss:$16 sps:$4 sm:$0xff]   ;;  %v971_v20 = vld [vmem:[#allocation5 + $0x84] ss:$16 sps:$4 sm:$0xff]   ;;  %v973_v21 = vld [vmem:[#allocation5 + $0x8c] ss:$16 sps:$4 sm:$0xff]   ;;  %470 = vmatprep.mubr.bf16.mxu1 %v1150_v32  ;;  %v215_v32 = vlaneseq }
  0x3f   :  { %179 = vadd.xlane.f32.xlu1 %v176_v3  ;;  %398 = vmatpush1.bf16.msra.mxu0 %v957_v10  ;;  %v975_v22 = vld [vmem:[#allocation5 + $0x80] ss:$16 sps:$4 sm:$0xff]   ;;  %v976_v23 = vld [vmem:[#allocation5 + $0x88] ss:$16 sps:$4 sm:$0xff]   ;;  %v977_v24 = vld [vmem:[#allocation5 + $0xa4] ss:$16 sps:$4 sm:$0xff]  }
  0x40   :  { %441 = vmatpush1.bf16.msra.mxu1 %v958_v11  ;;  %399 = vmatprep.subr.bf16.mxu0 %v959_v12  ;;  %v979_v25 = vld [vmem:[#allocation5 + $0xac] ss:$16 sps:$4 sm:$0xff]   ;;  %v981_v26 = vld [vmem:[#allocation5 + $0xa0] ss:$16 sps:$4 sm:$0xff]   ;;  %v982_v27 = vld [vmem:[#allocation5 + $0xa8] ss:$16 sps:$4 sm:$0xff]  }
  0x41   :  { %442 = vmatprep.subr.bf16.mxu1 %v961_v13  ;;  %v983_v28 = vld [vmem:[#allocation5 + $0xc4] ss:$16 sps:$4 sm:$0xff]   ;;  %v985_v29 = vld [vmem:[#allocation5 + $0xcc] ss:$16 sps:$4 sm:$0xff]   ;;  %v987_v30 = vld [vmem:[#allocation5 + $0xc0] ss:$16 sps:$4 sm:$0xff]  }
  0x42   :  { %v988_v31 = vld [vmem:[#allocation5 + $0xc8] ss:$16 sps:$4 sm:$0xff]   ;;  %v989_v33 = vld [vmem:[#allocation5 + $0xe4] ss:$16 sps:$4 sm:$0xff]   ;;  %v991_v34 = vld [vmem:[#allocation5 + $0xec] ss:$16 sps:$4 sm:$0xff]  }
  0x43   :  { %400 = vmatpush1.bf16.msra.mxu0 %v963_v14  ;;  %v993_v35 = vld [vmem:[#allocation5 + $0xe0] ss:$16 sps:$4 sm:$0xff]   ;;  %v994_v36 = vld [vmem:[#allocation5 + $0xe8] ss:$16 sps:$4 sm:$0xff]   ;;  %s812_s23 = sshll.u32 %s1151_s22, 4  ;;  %s813_s23 = int_to_ptr.vmem [resolvable:$true] %s812_s23 }
  0x44   :  { %443 = vmatpush1.bf16.msra.mxu1 %v964_v15  ;;  %401 = vmatprep.subr.bf16.mxu0 %v965_v16  ;;  %v995_v37 = vld [vmem:[#allocation7 + $0x40] sm:$0xff]   ;;  %v825_v56 = vld [vmem:[%s1271_s1] ss:$0 sm:$0xff]  ;;  %v999_v5 = vld [vmem:[#allocation7 + $0x48] sm:$0xff]   ;;  %p1118_p11 = scmp.lt.s32.totalorder %s813_s23, %s813_s23 }
  0x45   :  { %444 = vmatprep.subr.bf16.mxu1 %v967_v17  ;;  %v996_v38 = vld [vmem:[#allocation7 + $0xc0] sm:$0xff]   ;;  %v826_v61 = vld [vmem:[%s1272_s2] ss:$0 sm:$0xff]  ;;  %v1000_v6 = vld [vmem:[#allocation7 + $0xc8] sm:$0xff]  }
  0x46   :  { %v997_v3 = vld [vmem:[#allocation7] sm:$0xff]   ;;  %v1002_v7 = vld [vmem:[#allocation7 + $0x88] sm:$0xff]   ;;  %v1003_v8 = vld [vmem:[#allocation7 + $0x50] sm:$0xff]  }
  0x47   :  { %402 = vmatpush1.bf16.msra.mxu0 %v969_v18  ;;  %v1004_v9 = vld [vmem:[#allocation7 + $0xd0] sm:$0xff]   ;;  %v1007_v12 = vld [vmem:[#allocation7 + $0x58] sm:$0xff]   ;;  %v1011_v16 = vld [vmem:[#allocation7 + $0x60] sm:$0xff]  }
  0x48   :  { %445 = vmatpush1.bf16.msra.mxu1 %v970_v19  ;;  %403 = vmatprep.subr.bf16.mxu0 %v971_v20  ;;  %v1005_v10 = vld [vmem:[#allocation7 + $0x10] sm:$0xff]   ;;  %v1008_v13 = vld [vmem:[#allocation7 + $0xd8] sm:$0xff]   ;;  %v1012_v17 = vld [vmem:[#allocation7 + $0xe0] sm:$0xff]  }
  0x49   :  { %446 = vmatprep.subr.bf16.mxu1 %v973_v21  ;;  %v1006_v11 = vld [vmem:[#allocation7 + $0x90] sm:$0xff]   ;;  %v1009_v14 = vld [vmem:[#allocation7 + $0x18] sm:$0xff]   ;;  %v1013_v18 = vld [vmem:[#allocation7 + $0x20] sm:$0xff]  }
  0x4a   :  { %v1010_v15 = vld [vmem:[#allocation7 + $0x98] sm:$0xff]   ;;  %v1014_v19 = vld [vmem:[#allocation7 + $0xa0] sm:$0xff]   ;;  %v1015_v20 = vld [vmem:[#allocation7 + $0x68] sm:$0xff]  }
  0x4b   :  { %404 = vmatpush1.bf16.msra.mxu0 %v975_v22  ;;  %v1016_v21 = vld [vmem:[#allocation7 + $0xe8] sm:$0xff]  }
  0x4c   :  { %447 = vmatpush1.bf16.msra.mxu1 %v976_v23  ;;  %405 = vmatprep.subr.bf16.mxu0 %v977_v24  ;;  %v1017_v22 = vld [vmem:[#allocation7 + $0x28] sm:$0xff]   ;;  %v1019_v24 = vld [vmem:[#allocation7 + $0x70] sm:$0xff]  }
  0x4d   :  { %448 = vmatprep.subr.bf16.mxu1 %v979_v25  ;;  %v1018_v23 = vld [vmem:[#allocation7 + $0xa8] sm:$0xff]   ;;  %v1020_v25 = vld [vmem:[#allocation7 + $0xf0] sm:$0xff]  }
  0x4f   :  { %406 = vmatpush1.bf16.msra.mxu0 %v981_v26  ;;  %v1021_v26 = vld [vmem:[#allocation7 + $0x30] sm:$0xff]  }
  0x50   :  { %449 = vmatpush1.bf16.msra.mxu1 %v982_v27  ;;  %407 = vmatprep.subr.bf16.mxu0 %v983_v28  ;;  %v1022_v27 = vld [vmem:[#allocation7 + $0xb0] sm:$0xff]   ;;  %v1023_v28 = vld [vmem:[#allocation7 + $0x78] sm:$0xff]  }
  0x51   :  { %450 = vmatprep.subr.bf16.mxu1 %v985_v29  ;;  %v1024_v29 = vld [vmem:[#allocation7 + $0xf8] sm:$0xff]  }
  0x53   :  { %408 = vmatpush1.bf16.msra.mxu0 %v987_v30  ;;  %v1025_v30 = vld [vmem:[#allocation7 + $0x38] sm:$0xff]  }
  0x54   :  { %451 = vmatpush1.bf16.msra.mxu1 %v988_v31  ;;  %409 = vmatprep.subr.bf16.mxu0 %v989_v33  ;;  %v1026_v31 = vld [vmem:[#allocation7 + $0xb8] sm:$0xff]   ;;  %v216_v33 = vshrl.u32 %v215_v32, 7 }
  0x55   :  { %452 = vmatprep.subr.bf16.mxu1 %v991_v34 }
  0x56   :  { %v217_v34 = vsub.s32 0, %v216_v33 }
  0x57   :  { %410 = vmatpush1.bf16.msra.mxu0 %v993_v35  ;;  %v225_v35 = vsub.s32 2, %v216_v33 }
  0x58   :  { %453 = vmatpush1.bf16.msra.mxu1 %v994_v36  ;;  %892 = vmatprep.subr.bf16.mxu0 %v995_v37  ;;  %v71_v36 = vld [vmem:[%s1274_s4] sm:$0xf]  ;;  %v221_v37 = vsub.s32 1, %v216_v33 }
  0x59   :  { %914 = vmatprep.subr.bf16.mxu1 %v996_v38  ;;  %v229_v38 = vsub.s32 3, %v216_v33 }
  0xc6   :  { %v172_v39 = vpop.xlane.xlu0 %171 }
  0xc7   :  { %v181_v40 = vmul.f32 0.0078125, %v172_v39  ;;  %v218_v39 = vrot.slane %v71_v36, %v217_v34 }
  0xc8   :  { %v178_v41 = vpop.xlane.xlu1 %177 }
  0xc9   :  { %v185_v42 = vmul.f32 %v181_v40, %v181_v40  ;;  %v183_v43 = vmul.f32 0.0078125, %v178_v41  ;;  %v189_v53 = vsub.f32 %v1231_v0, %v181_v40  ;;  %v998_v0 = vld [vmem:[#allocation7 + $0x80] sm:$0xff]   ;;  %v226_v40 = vrot.slane %v71_v36, %v225_v35 }
  0xca   :  { %v174_v44 = vpop.xlane.xlu0 %173  ;;  %v222_v41 = vrot.slane %v71_v36, %v221_v37 }
  0xcb   :  { %v187_v45 = vsub.f32 %v183_v43, %v185_v42  ;;  %v182_v46 = vmul.f32 0.0078125, %v174_v44  ;;  %v230_v42 = vrot.slane %v71_v36, %v229_v38 }
  0xcc   :  { %v180_v47 = vpop.xlane.xlu1 %179 }
  0xcd   :  { %v191_v48 = vadd.f32 1e-05, %v187_v45  ;;  %v186_v49 = vmul.f32 %v182_v46, %v182_v46  ;;  %v184_v50 = vmul.f32 0.0078125, %v180_v47  ;;  %v190_v57 = vsub.f32 %v1233_v1, %v182_v46  ;;  %v1001_v1 = vld [vmem:[#allocation7 + $0x8] sm:$0xff]  }
  0xcf   :  { %1027 = vrsqrt.f32 %v191_v48  ;;  %v188_v51 = vsub.f32 %v184_v50, %v186_v49 }
  0xd1   :  { %v192_v52 = vadd.f32 1e-05, %v188_v51 }
  0xd3   :  { %1029 = vrsqrt.f32 %v192_v52 }
  0xd9   :  { %v1028_v54 = vpop.eup %1027 }
  0xda   :  { %v195_v55 = vmul.f32 %v1028_v54, %v189_v53 }
  0xdc   :  { %v203_v60 = vmul.f32 %v825_v56, %v195_v55 }
  0xdd   :  { %v1030_v58 = vpop.eup %1029 }
  0xde   :  { %v196_v59 = vmul.f32 %v1030_v58, %v190_v57  ;;  %v211_v63 = vadd.f32 %v826_v61, %v203_v60 }
  0xe0   :  { %v204_v62 = vmul.f32 %v825_v56, %v196_v59 }
  0xe2   :  { %v212_v2 = vadd.f32 %v826_v61, %v204_v62 }
  0xe4   :  { %v213_v4 = vpack.c.bf16 %v212_v2, %v211_v63 }
  0xe6   :  { %428 = vmatmul.mubr.bf16.vlgmr.msra.gmra.mrb[0].mxu0 %v213_v4  ;;  %471 = vmatmul.mubr.bf16.vlgmr.msra.gmra.mrb[0].mxu1 %v213_v4 }
  0xe7   :  { %893 = vmatpush3.bf16.msra.mxu0 %v997_v3  ;;  %915 = vmatpush3.bf16.msra.mxu1 %v998_v0 }
  0xe8   :  { %894 = vmatprep.subr.bf16.mxu0 %v999_v5  ;;  %916 = vmatprep.subr.bf16.mxu1 %v1000_v6 }
  0xeb   :  { %895 = vmatpush3.bf16.msra.mxu0 %v1001_v1  ;;  %917 = vmatpush3.bf16.msra.mxu1 %v1002_v7 }
  0xec   :  { %896 = vmatprep.subr.bf16.mxu0 %v1003_v8  ;;  %918 = vmatprep.subr.bf16.mxu1 %v1004_v9 }
  0xef   :  { %897 = vmatpush3.bf16.msra.mxu0 %v1005_v10  ;;  %919 = vmatpush3.bf16.msra.mxu1 %v1006_v11 }
  0xf0   :  { %898 = vmatprep.subr.bf16.mxu0 %v1007_v12  ;;  %920 = vmatprep.subr.bf16.mxu1 %v1008_v13 }
  0xf3   :  { %899 = vmatpush3.bf16.msra.mxu0 %v1009_v14  ;;  %921 = vmatpush3.bf16.msra.mxu1 %v1010_v15 }
  0xf4   :  { %900 = vmatprep.subr.bf16.mxu0 %v1011_v16  ;;  %922 = vmatprep.subr.bf16.mxu1 %v1012_v17 }
  0xf7   :  { %901 = vmatpush3.bf16.msra.mxu0 %v1013_v18  ;;  %923 = vmatpush3.bf16.msra.mxu1 %v1014_v19 }
  0xf8   :  { %902 = vmatprep.subr.bf16.mxu0 %v1015_v20  ;;  %924 = vmatprep.subr.bf16.mxu1 %v1016_v21 }
  0xfb   :  { %903 = vmatpush3.bf16.msra.mxu0 %v1017_v22  ;;  %925 = vmatpush3.bf16.msra.mxu1 %v1018_v23 }
  0xfc   :  { %904 = vmatprep.subr.bf16.mxu0 %v1019_v24  ;;  %926 = vmatprep.subr.bf16.mxu1 %v1020_v25 }
  0xff   :  { %905 = vmatpush3.bf16.msra.mxu0 %v1021_v26  ;;  %927 = vmatpush3.bf16.msra.mxu1 %v1022_v27 }
 0x100   :  { %906 = vmatprep.subr.bf16.mxu0 %v1023_v28  ;;  %928 = vmatprep.subr.bf16.mxu1 %v1024_v29 }
 0x103   :  { %907 = vmatpush3.bf16.msra.mxu0 %v1025_v30  ;;  %929 = vmatpush3.bf16.msra.mxu1 %v1026_v31 }
 0x1b9   :  { %v429_v43 = vpop.f32.mrb[0].mxu0  ;;  %v472_v44 = vpop.f32.mrb[0].mxu1 }
 0x1ba   :  { %v430_v45 = vadd.f32 %v429_v43, %v218_v39  ;;  %v473_v46 = vadd.f32 %v472_v44, %v226_v40  ;;  %v431_v47 = vpop.f32.mrb[1].mxu0  ;;  %v474_v48 = vpop.f32.mrb[1].mxu1 }
 0x1bb   :  { %v432_v49 = vadd.f32 %v431_v47, %v222_v41  ;;  %v475_v50 = vadd.f32 %v474_v48, %v230_v42  ;;  %v433_v51 = vpop.f32.mrb[2].mxu0  ;;  %v476_v52 = vpop.f32.mrb[2].mxu1 }
 0x1bc   :  { %v489_v53 = vmul.f32 0.70710677, %v430_v45  ;;  %v491_v54 = vmul.f32 0.70710677, %v473_v46  ;;  %v434_v57 = vadd.f32 %v433_v51, %v218_v39  ;;  %v477_v58 = vadd.f32 %v476_v52, %v226_v40  ;;  %v435_v59 = vpop.f32.mrb[3].mxu0  ;;  %v478_v60 = vpop.f32.mrb[3].mxu1 }
 0x1bd   :  { %v490_v55 = vmul.f32 0.70710677, %v432_v49  ;;  %v492_v56 = vmul.f32 0.70710677, %v475_v50  ;;  %v436_v61 = vadd.f32 %v435_v59, %v222_v41  ;;  %v479_v62 = vadd.f32 %v478_v60, %v230_v42  ;;  %v859_v41 = vld [vmem:[%s1276_s6] ss:$0 sm:$0xff] }
 0x1be   :  { %1031 = verf.f32 %v489_v53  ;;  %v493_v63 = vmul.f32 0.70710677, %v434_v57  ;;  %v495_v2 = vmul.f32 0.70710677, %v477_v58  ;;  %v481_v9 = vmul.f32 0.5, %v430_v45  ;;  %s1113_s6 = scalar_lea.vmem %s813_s23, 256 }
 0x1bf   :  { %1033 = verf.f32 %v491_v54  ;;  %v494_v3 = vmul.f32 0.70710677, %v436_v61  ;;  %v496_v0 = vmul.f32 0.70710677, %v479_v62  ;;  %v483_v10 = vmul.f32 0.5, %v473_v46  ;;  %p1114_p10 = scmp.ne.s32.totalorder %s813_s23, %s1113_s6  ;;  %p1119_p12 = scmp.lt.s32.totalorder %s1113_s6, %s1113_s6 }
 0x1c0   :  { %1035 = verf.f32 %v490_v55  ;;  %v482_v13 = vmul.f32 0.5, %v432_v49  ;;  %v485_v15 = vmul.f32 0.5, %v434_v57  ;;  %v484_v18 = vmul.f32 0.5, %v475_v50 }
 0x1c1   :  { %1037 = verf.f32 %v492_v56  ;;  %v487_v20 = vmul.f32 0.5, %v477_v58  ;;  %v486_v25 = vmul.f32 0.5, %v436_v61  ;;  %v488_v29 = vmul.f32 0.5, %v479_v62  ;;  %p1120_p13 = por %p1119_p12, %p1118_p11 }
 0x1c2   :  { %1039 = verf.f32 %v493_v63 }
 0x1c3   :  { %1041 = verf.f32 %v495_v2  ;;  %p1121_p0 = pnand %p1120_p13, %p1114_p10 }
 0x1c4   :  { %1043 = verf.f32 %v494_v3 }
 0x1c5   :  { %1045 = verf.f32 %v496_v0 }
 0x1c8   :  { %v1032_v4 = vpop.eup %1031 }
 0x1c9   :  { %v1034_v5 = vpop.eup %1033  ;;  %v505_v7 = vadd.f32 1.0, %v1032_v4 }
 0x1ca   :  { %v1036_v6 = vpop.eup %1035  ;;  %v507_v11 = vadd.f32 1.0, %v1034_v5 }
 0x1cb   :  { %v1038_v1 = vpop.eup %1037  ;;  %v506_v14 = vadd.f32 1.0, %v1036_v6  ;;  %v513_v23 = vmul.f32 %v505_v7, %v481_v9 }
 0x1cc   :  { %v1040_v8 = vpop.eup %1039  ;;  %v508_v19 = vadd.f32 1.0, %v1038_v1  ;;  %v515_v27 = vmul.f32 %v507_v11, %v483_v10 }
 0x1cd   :  { %v1042_v12 = vpop.eup %1041  ;;  %v509_v16 = vadd.f32 1.0, %v1040_v8  ;;  %v514_v31 = vmul.f32 %v506_v14, %v482_v13 }
 0x1ce   :  { %v1044_v17 = vpop.eup %1043  ;;  %v511_v21 = vadd.f32 1.0, %v1042_v12  ;;  %v516_v34 = vmul.f32 %v508_v19, %v484_v18 }
 0x1cf   :  { %v1046_v22 = vpop.eup %1045  ;;  %v517_v24 = vmul.f32 %v509_v16, %v485_v15  ;;  %v510_v26 = vadd.f32 1.0, %v1044_v17 }
 0x1d0   :  { %v519_v28 = vmul.f32 %v511_v21, %v487_v20  ;;  %v512_v30 = vadd.f32 1.0, %v1046_v22 }
 0x1d1   :  { %v521_v32 = vpack.c.bf16 %v517_v24, %v513_v23  ;;  %v518_v33 = vmul.f32 %v510_v26, %v486_v25 }
 0x1d2   :  { %v523_v35 = vpack.c.bf16 %v519_v28, %v515_v27  ;;  %v520_v36 = vmul.f32 %v512_v30, %v488_v29 }
 0x1d3   :  { %v522_v37 = vpack.c.bf16 %v518_v33, %v514_v31 }
 0x1d4   :  { %v524_v38 = vpack.c.bf16 %v520_v36, %v516_v34 }
 0x1d5   :  { %755 = vmatprep.mubr.bf16.mxu0 %v522_v37 }
 0x1d6   :  { %796 = vmatprep.mubr.bf16.mxu1 %v524_v38  ;;  %756 = vmatmul.mubr.bf16.vlgmr.msra.gmra.mrb[4].mxu0 %v521_v32 }
 0x1d7   :  { %797 = vmatmul.mubr.bf16.vlgmr.msra.gmra.mrb[4].mxu1 %v523_v35 }
 0x2a9   :  { %v908_v39 = vpop.f32.mrb[4].mxu0 }
 0x2aa   :  { %v930_v40 = vpop.f32.mrb[4].mxu1  ;;  %v909_v42 = vpop.f32.mrb[5].mxu0 }
 0x2ab   :  { %v910_v43 = vadd.f32 %v909_v42, %v908_v39  ;;  %v931_v44 = vpop.f32.mrb[5].mxu1  ;;  %v911_v45 = vpop.f32.mrb[6].mxu0 }
 0x2ac   :  { %v932_v46 = vadd.f32 %v931_v44, %v930_v40  ;;  %v933_v47 = vpop.f32.mrb[6].mxu1  ;;  %v912_v48 = vpop.f32.mrb[7].mxu0 }
 0x2ad   :  { %v758_v49 = vadd.f32 %v910_v43, %v859_v41  ;;  %v913_v50 = vadd.f32 %v912_v48, %v911_v45  ;;  %v934_v51 = vpop.f32.mrb[7].mxu1 }
 0x2ae   :  { %v935_v52 = vadd.f32 %v934_v51, %v933_v47 }
 0x2af   :  { %v799_v53 = vadd.f32 %v932_v46, %v758_v49  ;;  %v761_v54 = vadd.f32 %v913_v50, %v859_v41 }
 0x2b1   :  { %805 = vst [vmem:[#allocation8] sm:$0xff] %v799_v53  ;;  %v802_v55 = vadd.f32 %v935_v52, %v761_v54 }
 0x2b3   :  { %806 = vst [vmem:[#allocation8 + $0x8] sm:$0xff] %v802_v55 }
 0x2b4   :  { %1124 = shalt.err (!%p1121_p0)
}
 0x2b5   :  { %s1125_s27 = scalar_lea.hbm %s1277_s7, 256 }
 0x2b6   :  { %p1126_p1 = scmp.ne.s32.totalorder %s1277_s7, %s1125_s27  ;;  %p1129_p2 = scmp.lt.u32.totalorder %s1125_s27, %s1277_s7 }
 0x2b8   :  { %p1131_p3 = pnand %p1129_p2, %p1126_p1 }
 0x2ba   :  { %1134 = shalt.err (!%p1131_p3)
}
 0x2bb   :  { %818 = dma.vmem_to_hbm [thread:$0]  %s813_s23, 256, %s1277_s7, [#allocation4], %s1145_s3, %s1145_s3, %s1146_s25  }
 0x2bc   :  { %1139 = dma.done.wait [#allocation4], 256  }
 0x2bd   :  { %1140 = vsyncadd [#allocation4], 4294967040 }
 0x2be   :  { %822 = vsyncpa [#allocation3], 1 }
 0x2bf   :  { %823 = vsyncpa [#allocation6], 1 }
 0x2c0   :  { %824 = vsyncpa [#allocation4], 1 }

</bundles_post_ra>
